<compile_context>
chip_gen: v7x
topology: tpu7x:2x2x1
jax: 0.10.0
libtpu: 0.0.40
codegen_flags: <defaults>
</compile_context>

<pallas_src>
import functools

import jax
import jax.numpy as jnp
from jax import lax
from jax.experimental import pallas as pl
from jax.experimental.pallas import tpu as pltpu


def _round_up(x, m):
    return (x + m - 1) // m * m


def _conv_bn_lrelu_kernel(x_ref, w_ref, scale_ref, shift_ref, o_ref, *,
                          kh_size, stride, toh, ow_pad, q_len, neg_slope):
    """One (batch, OH-tile, OC-tile) grid step of the fused implicit GEMM.

    x_ref:     [1, s*Q, OW_pad, K]  bf16  KW-folded, stride-phase-decomposed band
    w_ref:     [J*KH, K, TN]        bf16  full weights, resident for the launch
    scale_ref: [1, TN]              f32   BN scale  (gamma / sqrt(var + eps))
    shift_ref: [1, TN]              f32   BN shift  (beta - mean * scale)
    o_ref:     [1, TOH*OW_pad, TN]        lane-dense NHWC-flavoured output tile
    """
    j = pl.program_id(2)                      # OC tile index (innermost axis)
    m = toh * ow_pad
    k_dim = x_ref.shape[-1]

    # KH taps, all static contiguous slices along the major (row) dim; the
    # accumulation is one expression -> no acc scratch RMW passes.
    acc = None
    for kh in range(kh_size):
        ph, jh = kh % stride, kh // stride    # stride phase / in-phase offset
        start = ph * q_len + jh               # static Python int
        lhs = x_ref[0, start:start + toh]     # [TOH, OW_pad, K]
        lhs = lhs.reshape(m, k_dim)           # layout-preserving (OW_pad % 16 == 0)
        rhs = w_ref[j * kh_size + kh]         # [K, TN]  (dynamic leading index)
        d = jnp.dot(lhs, rhs, preferred_element_type=jnp.float32)
        acc = d if acc is None else acc + d

    # Fused epilogue: BN (f32) + LeakyReLU(0.1) + cast, single lane-dense store.
    y = acc * scale_ref[...] + shift_ref[...]
    y = jnp.where(y > 0, y, neg_slope * y)
    o_ref[0] = y.astype(o_ref.dtype)


def conv_bn_leaky_relu_nhwc(x_nhwc, weight, gamma, beta, running_mean,
                            running_var, *, stride=1, padding=1, eps=1e-5,
                            negative_slope=0.1, compute_dtype=jnp.bfloat16,
                            out_dtype=None, tn=None, target_m=1024):
    """x_nhwc: [N, H, W, C]; weight: [OC, C, KH, KW] (PyTorch OIHW layout).
    Returns NHWC [N, OH, OW, OC] in `out_dtype` (default: compute_dtype)."""
    n, h, w, c = x_nhwc.shape
    oc, c_w, kh_size, kw_size = weight.shape
    assert c == c_w, (c, c_w)
    s = int(stride)
    out_dtype = compute_dtype if out_dtype is None else out_dtype

    oh = (h + 2 * padding - kh_size) // s + 1
    ow = (w + 2 * padding - kw_size) // s + 1

    # ---- BatchNorm (running stats) -> per-channel scale + shift (f32 epilogue).
    scale = (gamma / jnp.sqrt(running_var + eps)).astype(jnp.float32)
    shift = (beta - running_mean * scale).astype(jnp.float32)

    # ---- Tile sizes -------------------------------------------------------
    oc_pad = _round_up(oc, 128)
    if tn is None:
        # v6e/v7x (2x256^2 MXU) like TN=256; pass tn=128 on v5e (4x128^2 MXU).
        tn = 256 if oc_pad % 256 == 0 else 128
    j_tiles = oc_pad // tn

    sub = 16 if jnp.dtype(compute_dtype) == jnp.dtype(jnp.bfloat16) else 8
    ow_pad = _round_up(ow, sub)          # dead columns are computed + sliced away
    toh = max(1, min(oh, max(1, target_m // ow_pad)))   # M_tile ~ target_m
    t_tiles = pl.cdiv(oh, toh)
    m_tile = toh * ow_pad

    k_dim = kw_size * c                  # KW folded into the contraction
    q_len = toh + (kh_size - 1) // s     # rows per stride-phase plane
    p_rows = s * q_len                   # rows stored per activation band

    # ---- Activations: zero-pad, bf16, KW-fold (+W-stride), row-band gather --
    hp_needed = (t_tiles - 1) * toh * s + (q_len - 1) * s + (s - 1) + 1
    hp_total = max(h + 2 * padding, hp_needed)
    wp_needed = (ow_pad - 1) * s + kw_size
    wp_total = max(w + 2 * padding, wp_needed)
    x_pad = jnp.pad(x_nhwc.astype(compute_dtype),
                    ((0, 0), (padding, hp_total - h - padding),
                     (padding, wp_total - w - padding), (0, 0)))
    # Partial im2col over KW, absorbing the W-stride: [N, HP, OW_pad, KW*C].
    x2 = jnp.concatenate(
        [x_pad[:, :, kw:kw + (ow_pad - 1) * s + 1:s, :] for kw in range(kw_size)],
        axis=-1)
    # Row-band gather with stride-phase decomposition: every in-kernel tap slice
    # becomes a static contiguous slice along a major dim (no strided/sublane
    # selection in the hot loop), for any stride.
    row_idx = (jnp.arange(t_tiles)[:, None, None] * (toh * s)
               + jnp.arange(s)[None, :, None]
               + jnp.arange(q_len)[None, None, :] * s).reshape(-1)
    x_bands = jnp.take(x2, row_idx, axis=1)
    x_bands = x_bands.reshape(n * t_tiles, p_rows, ow_pad, k_dim)

    # ---- Weights: OIHW -> [KH, KW*C, OC_pad] -> [J*KH, K, TN] bf16, resident.
    w2 = jnp.transpose(weight, (2, 3, 1, 0)).reshape(kh_size, k_dim, oc)
    w2 = jnp.pad(w2, ((0, 0), (0, 0), (0, oc_pad - oc))).astype(compute_dtype)
    w2 = w2.reshape(kh_size, k_dim, j_tiles, tn)
    w2 = jnp.transpose(w2, (2, 0, 1, 3)).reshape(j_tiles * kh_size, k_dim, tn)

    scale_p = jnp.pad(scale, (0, oc_pad - oc)).reshape(1, oc_pad)
    shift_p = jnp.pad(shift, (0, oc_pad - oc)).reshape(1, oc_pad)

    # ---- Scoped-VMEM budget from the actual block footprint ----------------
    itm = jnp.dtype(compute_dtype).itemsize
    footprint = (2 * p_rows * ow_pad * k_dim * itm                  # x band (x2 buf)
                 + 2 * j_tiles * kh_size * k_dim * tn * itm         # resident weights
                 + 2 * m_tile * tn * jnp.dtype(out_dtype).itemsize  # out tile (x2 buf)
                 + 2 * m_tile * tn * 4                              # f32 accum temps
                 + 8 * oc_pad * 4)                                  # scale/shift
    vmem_limit = int(min(64 * 2**20, max(32 * 2**20, 2 * footprint + (4 << 20))))

    grid = (n, t_tiles, j_tiles)
    kernel = functools.partial(
        _conv_bn_lrelu_kernel, kh_size=kh_size, stride=s, toh=toh,
        ow_pad=ow_pad, q_len=q_len, neg_slope=negative_slope)

    out = pl.pallas_call(
        kernel,
        out_shape=jax.ShapeDtypeStruct((n, t_tiles * m_tile, oc_pad), out_dtype),
        grid=grid,
        in_specs=[
            # Activation band: OC is the innermost grid axis, so this block is
            # only re-DMA'd when (batch, OH-tile) changes -> single-pass reads.
            pl.BlockSpec((1, p_rows, ow_pad, k_dim),
                         lambda i, t, j: (i * t_tiles + t, 0, 0, 0)),
            # Full weights: constant block index -> DMA'd once, VMEM-resident.
            pl.BlockSpec((j_tiles * kh_size, k_dim, tn),
                         lambda i, t, j: (0, 0, 0)),
            pl.BlockSpec((1, tn), lambda i, t, j: (0, j)),
            pl.BlockSpec((1, tn), lambda i, t, j: (0, j)),
        ],
        out_specs=pl.BlockSpec((1, m_tile, tn), lambda i, t, j: (i, t, j)),
        compiler_params=pltpu.CompilerParams(
            dimension_semantics=("parallel", "parallel", "parallel"),
            vmem_limit_bytes=vmem_limit),
    )(x_bands, w2, scale_p, shift_p)

    # Slice away OC / OW / OH padding; stay NHWC (+ compute dtype) between layers.
    out = out.reshape(n, t_tiles * toh, ow_pad, oc_pad)[:, :oh, :ow, :oc]
    return out


def convolutional_layer(x, weight, gamma, beta, running_mean, running_var, *,
                        stride=1, padding=1, eps=1e-5, negative_slope=0.1):
    """Matches ConvolutionalLayer.forward for NCHW inputs (BatchNorm in
    inference/running-stat mode).  NCHW permute only at the model boundary."""
    x_nhwc = jnp.transpose(x, (0, 2, 3, 1))
    y = conv_bn_leaky_relu_nhwc(x_nhwc, weight, gamma, beta, running_mean,
                                running_var, stride=stride, padding=padding,
                                eps=eps, negative_slope=negative_slope)
    return jnp.transpose(y, (0, 3, 1, 2)).astype(x.dtype)


if __name__ == "__main__":
    key = jax.random.PRNGKey(0)
    k1, k2, k3, k4, k5, k6 = jax.random.split(key, 6)

    N, C, H, W = 2, 4, 16, 16
    OC, KH, KW = 32, 3, 3

    x = jax.random.normal(k1, (N, C, H, W), jnp.float32)
    weight = jax.random.normal(k2, (OC, C, KH, KW), jnp.float32) * 0.1
    gamma = jax.random.uniform(k3, (OC,), jnp.float32, minval=0.5, maxval=1.5)
    beta = jax.random.normal(k4, (OC,), jnp.float32) * 0.1
    running_mean = jax.random.normal(k5, (OC,), jnp.float32) * 0.1
    running_var = jax.random.uniform(k6, (OC,), jnp.float32, minval=0.5, maxval=1.5)

    def reference(x_in, stride, padding):
        # Plain-JAX reference with the same precision choices (bf16 operands,
        # f32 accumulation, BN + LeakyReLU in f32).
        sc = gamma / jnp.sqrt(running_var + 1e-5)
        sh = beta - running_mean * sc
        xb = jnp.transpose(x_in, (0, 2, 3, 1)).astype(jnp.bfloat16).astype(jnp.float32)
        wb = jnp.transpose(weight, (2, 3, 1, 0)).astype(jnp.bfloat16).astype(jnp.float32)
        r = lax.conv_general_dilated(
            xb, wb, window_strides=(stride, stride),
            padding=[(padding, padding), (padding, padding)],
            dimension_numbers=("NHWC", "HWIO", "NHWC"))
        r = r * sc[None, None, None, :] + sh[None, None, None, :]
        r = jnp.where(r > 0, r, 0.1 * r)
        return jnp.transpose(r, (0, 3, 1, 2))

    for stride, padding in [(1, 1), (2, 1)]:
        out = convolutional_layer(x, weight, gamma, beta, running_mean,
                                  running_var, stride=stride, padding=padding)
        out = jax.block_until_ready(out)
        oh = (H + 2 * padding - KH) // stride + 1
        ow = (W + 2 * padding - KW) // stride + 1
        assert out.shape == (N, OC, oh, ow), out.shape
        ref = reference(x, stride, padding)
        max_err = float(jnp.max(jnp.abs(out - ref)))
        assert max_err < 8e-2, f"stride={stride}: max abs error {max_err}"

    print("KERNEL_OK")
</pallas_src>

<mosaic_0001>
module attributes {stable_mosaic.version = 11 : i64} {
  func.func @_conv_bn_lrelu_kernel(%arg0: i32, %arg1: i32, %arg2: i32, %arg3: memref<1x18x16x12xbf16, #tpu.memory_space<vmem>>, %arg4: memref<3x12x128xbf16, #tpu.memory_space<vmem>>, %arg5: memref<1x128xf32, #tpu.memory_space<vmem>>, %arg6: memref<1x128xf32, #tpu.memory_space<vmem>>, %arg7: memref<1x256x128xbf16, #tpu.memory_space<vmem>>) attributes {dimension_semantics = [#tpu.dimension_semantics<parallel>, #tpu.dimension_semantics<parallel>, #tpu.dimension_semantics<parallel>], iteration_bounds = array<i64: 2, 1, 1>, scalar_prefetch = 0 : i64, scratch_operands = 0 : i64, tpu.core_type = #tpu.core_type<tc>, window_params = [{transform_indices = @transform_0, window_bounds = array<i64: 1, 18, 16, 12>}, {pipeline_mode = #tpu.pipeline_mode<synchronous>, transform_indices = @transform_1, window_bounds = array<i64: 3, 12, 128>}, {transform_indices = @transform_2, window_bounds = array<i64: 1, 128>}, {transform_indices = @transform_3, window_bounds = array<i64: 1, 128>}, {transform_indices = @transform_4, window_bounds = array<i64: 1, 256, 128>}]} {
    %c0 = arith.constant 0 : index
    %c0_0 = arith.constant 0 : index
    %c0_1 = arith.constant 0 : index
    %c0_2 = arith.constant 0 : index
    %0 = vector.load %arg3[%c0, %c0_0, %c0_1, %c0_2] : memref<1x18x16x12xbf16, #tpu.memory_space<vmem>>, vector<1x16x16x12xbf16>
    %1 = vector.shape_cast %0 : vector<1x16x16x12xbf16> to vector<16x16x12xbf16>
    %2 = vector.shape_cast %1 : vector<16x16x12xbf16> to vector<256x12xbf16>
    %c3_i32 = arith.constant 3 : i32
    %3 = arith.muli %arg2, %c3_i32 : i32
    %c0_i32 = arith.constant 0 : i32
    %4 = arith.addi %3, %c0_i32 : i32
    %5 = arith.index_cast %4 : i32 to index
    %c0_3 = arith.constant 0 : index
    %c0_4 = arith.constant 0 : index
    %6 = vector.load %arg4[%5, %c0_3, %c0_4] : memref<3x12x128xbf16, #tpu.memory_space<vmem>>, vector<1x12x128xbf16>
    %7 = vector.shape_cast %6 : vector<1x12x128xbf16> to vector<12x128xbf16>
    %cst = arith.constant dense<0.000000e+00> : vector<256x128xf32>
    %8 = tpu.matmul %2, %7, %cst {dimension_numbers = #tpu.dot_dimension_numbers<[1], [0], [0], [1], [0, 0, 1, 1], [], []>} : vector<256x12xbf16>, vector<12x128xbf16>, vector<256x128xf32> -> vector<256x128xf32>
    %c0_5 = arith.constant 0 : index
    %c1 = arith.constant 1 : index
    %c0_6 = arith.constant 0 : index
    %c0_7 = arith.constant 0 : index
    %9 = vector.load %arg3[%c0_5, %c1, %c0_6, %c0_7] : memref<1x18x16x12xbf16, #tpu.memory_space<vmem>>, vector<1x16x16x12xbf16>
    %10 = vector.shape_cast %9 : vector<1x16x16x12xbf16> to vector<16x16x12xbf16>
    %11 = vector.shape_cast %10 : vector<16x16x12xbf16> to vector<256x12xbf16>
    %c3_i32_8 = arith.constant 3 : i32
    %12 = arith.muli %arg2, %c3_i32_8 : i32
    %c1_i32 = arith.constant 1 : i32
    %13 = arith.addi %12, %c1_i32 : i32
    %14 = arith.index_cast %13 : i32 to index
    %c0_9 = arith.constant 0 : index
    %c0_10 = arith.constant 0 : index
    %15 = vector.load %arg4[%14, %c0_9, %c0_10] : memref<3x12x128xbf16, #tpu.memory_space<vmem>>, vector<1x12x128xbf16>
    %16 = vector.shape_cast %15 : vector<1x12x128xbf16> to vector<12x128xbf16>
    %cst_11 = arith.constant dense<0.000000e+00> : vector<256x128xf32>
    %17 = tpu.matmul %11, %16, %cst_11 {dimension_numbers = #tpu.dot_dimension_numbers<[1], [0], [0], [1], [0, 0, 1, 1], [], []>} : vector<256x12xbf16>, vector<12x128xbf16>, vector<256x128xf32> -> vector<256x128xf32>
    %18 = arith.addf %8, %17 : vector<256x128xf32>
    %c0_12 = arith.constant 0 : index
    %c2 = arith.constant 2 : index
    %c0_13 = arith.constant 0 : index
    %c0_14 = arith.constant 0 : index
    %19 = vector.load %arg3[%c0_12, %c2, %c0_13, %c0_14] : memref<1x18x16x12xbf16, #tpu.memory_space<vmem>>, vector<1x16x16x12xbf16>
    %20 = vector.shape_cast %19 : vector<1x16x16x12xbf16> to vector<16x16x12xbf16>
    %21 = vector.shape_cast %20 : vector<16x16x12xbf16> to vector<256x12xbf16>
    %c3_i32_15 = arith.constant 3 : i32
    %22 = arith.muli %arg2, %c3_i32_15 : i32
    %c2_i32 = arith.constant 2 : i32
    %23 = arith.addi %22, %c2_i32 : i32
    %24 = arith.index_cast %23 : i32 to index
    %c0_16 = arith.constant 0 : index
    %c0_17 = arith.constant 0 : index
    %25 = vector.load %arg4[%24, %c0_16, %c0_17] : memref<3x12x128xbf16, #tpu.memory_space<vmem>>, vector<1x12x128xbf16>
    %26 = vector.shape_cast %25 : vector<1x12x128xbf16> to vector<12x128xbf16>
    %cst_18 = arith.constant dense<0.000000e+00> : vector<256x128xf32>
    %27 = tpu.matmul %21, %26, %cst_18 {dimension_numbers = #tpu.dot_dimension_numbers<[1], [0], [0], [1], [0, 0, 1, 1], [], []>} : vector<256x12xbf16>, vector<12x128xbf16>, vector<256x128xf32> -> vector<256x128xf32>
    %28 = arith.addf %18, %27 : vector<256x128xf32>
    %c0_19 = arith.constant 0 : index
    %c0_20 = arith.constant 0 : index
    %29 = vector.load %arg5[%c0_19, %c0_20] : memref<1x128xf32, #tpu.memory_space<vmem>>, vector<1x128xf32>
    %30 = vector.broadcast %29 : vector<1x128xf32> to vector<256x128xf32>
    %31 = arith.mulf %28, %30 : vector<256x128xf32>
    %c0_21 = arith.constant 0 : index
    %c0_22 = arith.constant 0 : index
    %32 = vector.load %arg6[%c0_21, %c0_22] : memref<1x128xf32, #tpu.memory_space<vmem>>, vector<1x128xf32>
    %33 = vector.broadcast %32 : vector<1x128xf32> to vector<256x128xf32>
    %34 = arith.addf %31, %33 : vector<256x128xf32>
    %cst_23 = arith.constant 0.000000e+00 : f32
    %35 = vector.broadcast %cst_23 : f32 to vector<256x128xf32>
    %36 = arith.cmpf ogt, %34, %35 : vector<256x128xf32>
    %cst_24 = arith.constant 1.000000e-01 : f32
    %37 = vector.broadcast %cst_24 : f32 to vector<256x128xf32>
    %38 = arith.mulf %37, %34 : vector<256x128xf32>
    %39 = arith.select %36, %34, %38 : vector<256x128xi1>, vector<256x128xf32>
    %40 = arith.truncf %39 : vector<256x128xf32> to vector<256x128xbf16>
    %c0_25 = arith.constant 0 : index
    %c0_26 = arith.constant 0 : index
    %c0_27 = arith.constant 0 : index
    %41 = vector.load %arg7[%c0_25, %c0_26, %c0_27] : memref<1x256x128xbf16, #tpu.memory_space<vmem>>, vector<1x256x128xbf16>
    %42 = vector.shape_cast %41 : vector<1x256x128xbf16> to vector<256x128xbf16>
    %43 = vector.shape_cast %40 : vector<256x128xbf16> to vector<1x256x128xbf16>
    tpu.vector_store %arg7[%c0_25, %c0_26, %c0_27], %43 {strides = array<i32>} : memref<1x256x128xbf16, #tpu.memory_space<vmem>>, vector<1x256x128xbf16>,
    return
  }
  func.func @transform_0(%arg0: i32, %arg1: i32, %arg2: i32) -> (i32, i32, i32, i32) {
    %c1_i32 = arith.constant 1 : i32
    %0 = arith.muli %arg0, %c1_i32 : i32
    %1 = arith.addi %0, %arg1 : i32
    %c0_i32 = arith.constant 0 : i32
    %c0_i32_0 = arith.constant 0 : i32
    %c0_i32_1 = arith.constant 0 : i32
    %c0_i32_2 = arith.constant 0 : i32
    return %1, %c0_i32, %c0_i32_0, %c0_i32_1 : i32, i32, i32, i32
  }
  func.func @transform_1(%arg0: i32, %arg1: i32, %arg2: i32) -> (i32, i32, i32) {
    %c0_i32 = arith.constant 0 : i32
    %c0_i32_0 = arith.constant 0 : i32
    %c0_i32_1 = arith.constant 0 : i32
    %c0_i32_2 = arith.constant 0 : i32
    return %c0_i32, %c0_i32_0, %c0_i32_1 : i32, i32, i32
  }
  func.func @transform_2(%arg0: i32, %arg1: i32, %arg2: i32) -> (i32, i32) {
    %c0_i32 = arith.constant 0 : i32
    %c0_i32_0 = arith.constant 0 : i32
    return %c0_i32, %arg2 : i32, i32
  }
  func.func @transform_3(%arg0: i32, %arg1: i32, %arg2: i32) -> (i32, i32) {
    %c0_i32 = arith.constant 0 : i32
    %c0_i32_0 = arith.constant 0 : i32
    return %c0_i32, %arg2 : i32, i32
  }
  func.func @transform_4(%arg0: i32, %arg1: i32, %arg2: i32) -> (i32, i32, i32) {
    %c0_i32 = arith.constant 0 : i32
    return %arg0, %arg1, %arg2 : i32, i32, i32
  }
}

</mosaic_0001>

<bundles_post_ra>
// kernel: tpu_custom_call.1
= control target key start
LH: loop header
LB: loop body
LE: loop exit
PB: predicated region body
PF: predicated region fallthrough
CT: control target
= control target key end

     0   :  { %9 = vsyncpa [#allocation3], 0  ;;  %s2896_s0 = inlined_call_operand.vmem [shape: bf16[2,18,16,12], index: 0, kind: input, shape index: {}]   ;;  %s2897_s1 = inlined_call_operand.vmem [shape: bf16[3,12,128], index: 1, kind: input, shape index: {}]   ;;  %s2898_s2 = inlined_call_operand.vmem [shape: f32[1,128], index: 2, kind: input, shape index: {}]   ;;  %s2899_s3 = inlined_call_operand.vmem [shape: f32[1,128], index: 3, kind: input, shape index: {}]   ;;  %s2900_s4 = inlined_call_operand.hbm [shape: bf16[2,256,128], index: 4, kind: output, shape index: {}]  }
   0x1   :  { %11 = vsyncpa [#allocation3 + $0x1], 0  ;;  %s2542_s15 = smov 0   ;;  %s2544_s16 = smov 0  }
   0x2   :  { %s2546_s17 = smov 0   ;;  %s2548_s18 = smov 0  }
   0x3   :  { %s2550_s19 = smov 0   ;;  %s2552_s20 = smov 0  }
   0x4 LB: > { %s1759_s21 = sadd.s32 4294967295, %s2512_s20   ;;  %s1760_s22 = sadd.s32 4294967294, %s2512_s20   ;;  %s2512_s20 = sphi %s2552_s20, %s17_s20   ;;  %s2508_s19 = sphi %s2550_s19, %s2907_s19   ;;  %s2504_s18 = sphi %s2548_s18, %s2906_s18   ;;  %s2500_s17 = sphi %s2546_s17, %s2905_s17   ;;  %s2496_s16 = sphi %s2544_s16, %s2904_s16   ;;  %s2492_s15 = sphi %s2542_s15, %s2903_s15  }
   0x5   : > { %s36_s23 = sadd.s32 1, %s2508_s19  ;;  %s148_s24 = sadd.s32 1, %s2500_s17 }
   0x6   : > { %p38_p0 = scmp.ge.s32.totalorder %s36_s23, 2  ;;  %p158_p1 = scmp.ne.s32.totalorder %s2500_s17, %s2496_s16 }
   0x7   : > { %p159_p2 = scmp.eq.s32.totalorder %s1759_s21, 1  ;;  %p164_p3 = scmp.ne.s32.totalorder %s2496_s16, %s2492_s15 }
   0x8   : > { %s2909_s23 = smov (%p38_p0, %s36_s23), 0  ;;  %p165_p5 = scmp.eq.s32.totalorder %s1760_s22, 1 }
   0x9   : > { %p2582_p4 = por %p159_p2, %p158_p1  ;;  %s141_s26 = ssub.s32 %s2508_s19, %s2909_s23 }
   0xa   : > { %p1765_p6 = scmp.ge.s32.totalorder %s2512_s20, 1  ;;  %p146_p7 = scmp.eq.s32.totalorder %s141_s26, 0 }
   0xb   : > { %p2589_p8 = por %p165_p5, %p164_p3  ;;  %p208_p9 = scmp.lt.s32.totalorder %s2512_s20, 3 }
   0xc   : > { %s2595_s28 = scalar_select %p146_p7, %s2500_s17, %s148_s24  }
   0xd   : > { %p209_p10 = pnand %p1765_p6, %p208_p9 }
   0xe   : > { %v2383_v0 = vld [vmem:[%s2897_s1 + $0x8] sm:$0x3f] (!%p209_p10)   ;;  %vm467_vm0 = vcmask (!%p209_p10), 1045504   ;;  %p242_p11 = scmp.lt.s32.totalorder (!%p209_p10), %s2504_s18, 1  ;;  %v2384_v1 = vld [vmem:[%s2897_s1] sm:$0x3f] (!%p209_p10)  }
   0xf   : > { %212 = sbr.rel (%p209_p10) target bundleno = 358 (0x166), region = 36  ;;  %2321 = vmatprep.subr.msk.bf16.mxu1 (!%p209_p10), %vm467_vm0, %v2383_v0  ;;  %v469_v2 = vsel (!%p209_p10), %vm467_vm0, %v2383_v0, 0  ;;  %v2387_v3 = vld [vmem:[%s2897_s1 + $0x10] sm:$0x3f] (!%p209_p10)   ;;  %2322 = vmatprep.subr.msk.bf16.mxu0 (!%p209_p10), %vm467_vm0, %v2384_v1  ;;  %v766_v4 = vsel (!%p209_p10), %vm467_vm0, %v2384_v1, 0  ;;  %vm418_vm1 = vcmask (!%p209_p10), 97280  }
  0x10   : > { %2154 = vmatpush3.bf16.msra.mxu1 (!%p209_p10), %v469_v2  ;;  %2188 = vmatpush3.bf16.msra.mxu0 (!%p209_p10), %v766_v4  ;;  %v1102_v9 = vsel (!%p209_p10), %vm467_vm0, %v2387_v3, 0  ;;  %s238_s26 = sand.u32 (!%p209_p10), 1, %s2496_s16   ;;  %s2006_s5 = sshll.u32 (!%p209_p10), %s2504_s18, 11 }
  0x11   : > { %2323 = vmatprep.subr.msk.bf16.mxu1 (!%p209_p10), %vm467_vm0, %v2384_v1  ;;  %2324 = vmatprep.subr.msk.bf16.mxu0 (!%p209_p10), %vm467_vm0, %v2387_v3  ;;  %s1766_s29 = sshll.u32 (!%p209_p10), %s238_s26, 7  ;;  %s2842_s9 = scalar_lea.hbm (!%p209_p10), %s2900_s4, %s2006_s5 }
  0x12   : > { %s2757_s30 = scalar_lea.vmem (!%p209_p10), [#allocation2], %s1766_s29  ;;  %s2514_s11 = smov (!%p209_p10), [#allocation2]  }
  0x13   : > { %s1648_s6 = sshll.u32 (!%p209_p10), %s2757_s30, 4  ;;  %s2438_s12 = sshll.u32 (!%p209_p10), %s2514_s11, 4  ;;  %s2844_s6 = int_to_ptr.vmem [resolvable:$true] %s1648_s6  ;;  %s2439_s12 = int_to_ptr.vmem [resolvable:$false] %s2438_s12 }
  0x14   : > { %p2441_p1 = scmp.lt.s32.totalorder (!%p209_p10), %s2844_s6, %s2439_s12 }
  0x16   : > { %s243_s7 = scalar_select %p242_p11, %s2504_s18, 1 }
  0x17   : > { %s2850_s18 = scalar_lea.sflag [#allocation3], %s238_s26 }
  0x18   : > { %s2325_s10 = smul.u32 144, %s243_s7 }
  0x1a   : > { %s2617_s13 = scalar_lea.vmem %s2896_s0, %s2325_s10  ;;  %s2434_s10 = scalar_lea.vmem %s2844_s6, 2048 }
  0x1b   : > { %v2385_v5 = vld [vmem:[%s2617_s13 + $0x8] sm:$0xff]   ;;  %v2386_v6 = vld [vmem:[%s2617_s13] sm:$0xff]   ;;  %v2388_v7 = vld [vmem:[%s2617_s13 + $0x10] sm:$0xff]   ;;  %p2435_p12 = scmp.ne.s32.totalorder %s2844_s6, %s2434_s10 }
  0x1c   : > { %2155 = vmatprep.mubr.msk.bf16.mxu1 %vm418_vm1, %v2385_v5  ;;  %2189 = vmatprep.mubr.msk.bf16.mxu0 %vm418_vm1, %v2386_v6  ;;  %v2389_v8 = vld [vmem:[%s2617_s13 + $0x8] sm:$0xff]   ;;  %v2390_v10 = vld [vmem:[%s2617_s13 + $0x18] sm:$0xff]   ;;  %v2391_v11 = vld [vmem:[%s2617_s13 + $0x10] sm:$0xff]  }
  0x1d   : > { %2156 = vmatmul.mubr.msk.bf16.vlgmr.msra.gmra.mrb[0].mxu1 %vm418_vm1, %v2388_v7  ;;  %2190 = vmatmul.mubr.msk.bf16.vlgmr.msra.gmra.mrb[0].mxu0 %vm418_vm1, %v2389_v8  ;;  %v2392_v12 = vld [vmem:[%s2617_s13 + $0x20] sm:$0xff]   ;;  %v2393_v13 = vld [vmem:[%s2617_s13 + $0x18] sm:$0xff]   ;;  %v2394_v14 = vld [vmem:[%s2617_s13 + $0x28] sm:$0xff]   ;;  %p2436_p13 = pnand %p2435_p12, %p2582_p4 }
  0x1e   : > { %2256 = vmatpush3.bf16.msra.mxu1 %v766_v4  ;;  %2222 = vmatpush3.bf16.msra.mxu0 %v1102_v9  ;;  %v2395_v15 = vld [vmem:[%s2617_s13 + $0x20] sm:$0xff]   ;;  %v2396_v16 = vld [vmem:[%s2617_s13 + $0x30] sm:$0xff]   ;;  %v2397_v17 = vld [vmem:[%s2617_s13 + $0x28] sm:$0xff]  }
  0x1f   : > { %2159 = vmatprep.mubr.msk.bf16.mxu1 %vm418_vm1, %v2390_v10  ;;  %2193 = vmatprep.mubr.msk.bf16.mxu0 %vm418_vm1, %v2391_v11  ;;  %v2398_v18 = vld [vmem:[%s2617_s13 + $0x38] sm:$0xff]   ;;  %v2399_v19 = vld [vmem:[%s2617_s13 + $0x30] sm:$0xff]   ;;  %v2400_v20 = vld [vmem:[%s2617_s13 + $0x40] sm:$0xff]   ;;  %p2437_p0 = pneg %p2436_p13 }
  0x20   : > { %v2401_v21 = vld [vmem:[%s2617_s13 + $0x38] sm:$0xff]   ;;  %v2402_v22 = vld [vmem:[%s2617_s13 + $0x48] sm:$0xff]   ;;  %v2403_v23 = vld [vmem:[%s2617_s13 + $0x10] sm:$0xff]  }
  0x21   : > { %v2404_v24 = vld [vmem:[%s2617_s13 + $0x50] sm:$0xff]   ;;  %v2405_v25 = vld [vmem:[%s2617_s13 + $0x18] sm:$0xff]   ;;  %v2407_v27 = vld [vmem:[%s2617_s13 + $0x20] sm:$0xff]  }
  0x22   : > { %v2406_v26 = vld [vmem:[%s2617_s13 + $0x58] sm:$0xff]   ;;  %v2408_v28 = vld [vmem:[%s2617_s13 + $0x60] sm:$0xff]   ;;  %v2409_v29 = vld [vmem:[%s2617_s13 + $0x28] sm:$0xff]  }
  0x23   : > { %v2410_v30 = vld [vmem:[%s2617_s13 + $0x68] sm:$0xff]   ;;  %v2411_v31 = vld [vmem:[%s2617_s13 + $0x30] sm:$0xff]   ;;  %v2413_v33 = vld [vmem:[%s2617_s13 + $0x38] sm:$0xff]  }
  0x24   : > { %v2412_v32 = vld [vmem:[%s2617_s13 + $0x70] sm:$0xff]   ;;  %v2414_v34 = vld [vmem:[%s2617_s13 + $0x78] sm:$0xff]   ;;  %v2415_v35 = vld [vmem:[%s2617_s13 + $0x40] sm:$0xff]  }
  0x25   : > { %2160 = vmatmul.mubr.msk.bf16.gmra.mrb[4].mxu1 %vm418_vm1, %v2392_v12  ;;  %2194 = vmatmul.mubr.msk.bf16.gmra.mrb[4].mxu0 %vm418_vm1, %v2393_v13  ;;  %v2416_v36 = vld [vmem:[%s2617_s13 + $0x80] sm:$0xff]   ;;  %v2417_v37 = vld [vmem:[%s2617_s13 + $0x48] sm:$0xff]   ;;  %v2419_v39 = vld [vmem:[%s2617_s13 + $0x50] sm:$0xff]  }
  0x26   : > { %2163 = vmatprep.mubr.msk.bf16.mxu1 %vm418_vm1, %v2394_v14  ;;  %2197 = vmatprep.mubr.msk.bf16.mxu0 %vm418_vm1, %v2395_v15  ;;  %v2418_v38 = vld [vmem:[%s2617_s13 + $0x40] sm:$0xff]   ;;  %v2420_v40 = vld [vmem:[%s2617_s13 + $0x48] sm:$0xff]   ;;  %v2421_v41 = vld [vmem:[%s2617_s13 + $0x58] sm:$0xff]  }
  0x27   : > { %v2422_v42 = vld [vmem:[%s2617_s13 + $0x50] sm:$0xff]   ;;  %v2423_v43 = vld [vmem:[%s2617_s13 + $0x60] sm:$0xff]   ;;  %v2424_v44 = vld [vmem:[%s2617_s13 + $0x58] sm:$0xff]  }
  0x28   : > { %v2425_v45 = vld [vmem:[%s2617_s13 + $0x68] sm:$0xff]   ;;  %v2426_v46 = vld [vmem:[%s2617_s13 + $0x60] sm:$0xff]   ;;  %v2427_v47 = vld [vmem:[%s2617_s13 + $0x70] sm:$0xff]  }
  0x29   : > { %v2428_v48 = vld [vmem:[%s2617_s13 + $0x68] sm:$0xff]   ;;  %v2429_v49 = vld [vmem:[%s2617_s13 + $0x78] sm:$0xff]   ;;  %v2430_v50 = vld [vmem:[%s2617_s13 + $0x70] sm:$0xff]  }
  0x2a   : > { %v2431_v51 = vld [vmem:[%s2617_s13 + $0x80] sm:$0xff]   ;;  %v2432_v52 = vld [vmem:[%s2617_s13 + $0x78] sm:$0xff]   ;;  %v2433_v53 = vld [vmem:[%s2617_s13 + $0x88] sm:$0xff]   ;;  %s2440_s13 = scalar_lea.vmem %s2439_s12, 4096 }
  0x2b   : > { %v2735_v7 = vld [vmem:[%s2898_s2] ss:$0 sm:$0xff]  ;;  %p2442_p2 = scmp.lt.s32.totalorder %s2440_s13, %s2434_s10 }
  0x2c   : > { %v2740_v10 = vld [vmem:[%s2899_s3] ss:$0 sm:$0xff] }
  0x2d   : > { %2164 = vmatmul.mubr.msk.bf16.gmra.mrb[8].mxu1 %vm418_vm1, %v2396_v16  ;;  %2198 = vmatmul.mubr.msk.bf16.gmra.mrb[8].mxu0 %vm418_vm1, %v2397_v17  ;;  %p2443_p3 = por %p2442_p2, %p2441_p1 }
  0x2e   : > { %2167 = vmatprep.mubr.msk.bf16.mxu1 %vm418_vm1, %v2398_v18  ;;  %2201 = vmatprep.mubr.msk.bf16.mxu0 %vm418_vm1, %v2399_v19 }
  0x2f   : > { %p2444_p5 = pnand %p2443_p3, %p2437_p0 }
  0x35   : > { %2168 = vmatmul.mubr.msk.bf16.gmra.mrb[12].mxu1 %vm418_vm1, %v2400_v20  ;;  %2202 = vmatmul.mubr.msk.bf16.gmra.mrb[12].mxu0 %vm418_vm1, %v2401_v21 }
  0x36   : > { %2171 = vmatprep.mubr.msk.bf16.mxu1 %vm418_vm1, %v2402_v22  ;;  %2223 = vmatprep.mubr.msk.bf16.mxu0 %vm418_vm1, %v2403_v23 }
  0x3d   : > { %2172 = vmatmul.mubr.msk.bf16.gmra.mrb[16].mxu1 %vm418_vm1, %v2404_v24  ;;  %2224 = vmatmul.mubr.msk.bf16.vlgmr.msra.gmra.mrb[0].mxu0 %vm418_vm1, %v2405_v25 }
  0x3e   : > { %2175 = vmatprep.mubr.msk.bf16.mxu1 %vm418_vm1, %v2406_v26  ;;  %2227 = vmatprep.mubr.msk.bf16.mxu0 %vm418_vm1, %v2407_v27 }
  0x45   : > { %2176 = vmatmul.mubr.msk.bf16.gmra.mrb[20].mxu1 %vm418_vm1, %v2408_v28  ;;  %2228 = vmatmul.mubr.msk.bf16.gmra.mrb[4].mxu0 %vm418_vm1, %v2409_v29 }
  0x46   : > { %2179 = vmatprep.mubr.msk.bf16.mxu1 %vm418_vm1, %v2410_v30  ;;  %2231 = vmatprep.mubr.msk.bf16.mxu0 %vm418_vm1, %v2411_v31 }
  0x4d   : > { %2180 = vmatmul.mubr.msk.bf16.gmra.mrb[24].mxu1 %vm418_vm1, %v2412_v32  ;;  %2232 = vmatmul.mubr.msk.bf16.gmra.mrb[8].mxu0 %vm418_vm1, %v2413_v33 }
  0x4e   : > { %2183 = vmatprep.mubr.msk.bf16.mxu1 %vm418_vm1, %v2414_v34  ;;  %2235 = vmatprep.mubr.msk.bf16.mxu0 %vm418_vm1, %v2415_v35 }
  0x55   : > { %2184 = vmatmul.mubr.msk.bf16.gmra.mrb[28].mxu1 %vm418_vm1, %v2416_v36  ;;  %2236 = vmatmul.mubr.msk.bf16.gmra.mrb[12].mxu0 %vm418_vm1, %v2417_v37 }
  0x56   : > { %2205 = vmatprep.mubr.msk.bf16.mxu1 %vm418_vm1, %v2418_v38  ;;  %2239 = vmatprep.mubr.msk.bf16.mxu0 %vm418_vm1, %v2419_v39 }
  0x5d   : > { %2206 = vmatmul.mubr.msk.bf16.vlgmr.msra.gmra.mrb[16].mxu1 %vm418_vm1, %v2420_v40  ;;  %2240 = vmatmul.mubr.msk.bf16.gmra.mrb[16].mxu0 %vm418_vm1, %v2421_v41 }
  0x5e   : > { %2209 = vmatprep.mubr.msk.bf16.mxu1 %vm418_vm1, %v2422_v42  ;;  %2243 = vmatprep.mubr.msk.bf16.mxu0 %vm418_vm1, %v2423_v43 }
  0x65   : > { %2210 = vmatmul.mubr.msk.bf16.gmra.mrb[20].mxu1 %vm418_vm1, %v2424_v44  ;;  %2244 = vmatmul.mubr.msk.bf16.gmra.mrb[20].mxu0 %vm418_vm1, %v2425_v45 }
  0x66   : > { %2213 = vmatprep.mubr.msk.bf16.mxu1 %vm418_vm1, %v2426_v46  ;;  %2247 = vmatprep.mubr.msk.bf16.mxu0 %vm418_vm1, %v2427_v47 }
  0x6d   : > { %2214 = vmatmul.mubr.msk.bf16.gmra.mrb[24].mxu1 %vm418_vm1, %v2428_v48  ;;  %2248 = vmatmul.mubr.msk.bf16.gmra.mrb[24].mxu0 %vm418_vm1, %v2429_v49 }
  0x6e   : > { %2217 = vmatprep.mubr.msk.bf16.mxu1 %vm418_vm1, %v2430_v50  ;;  %2251 = vmatprep.mubr.msk.bf16.mxu0 %vm418_vm1, %v2431_v51 }
  0x75   : > { %2218 = vmatmul.mubr.msk.bf16.gmra.mrb[28].mxu1 %vm418_vm1, %v2432_v52  ;;  %2252 = vmatmul.mubr.msk.bf16.gmra.mrb[28].mxu0 %vm418_vm1, %v2433_v53 }
  0xf0   : > { %v2157_v54 = vpop.f32.mrb[0].mxu1 }
  0xf1   : > { %v505_v55 = vpop.f32.mrb[1].mxu1 }
  0xf2   : > { %v2158_v56 = vpop.f32.mrb[2].mxu1 }
  0xf3   : > { %v508_v57 = vpop.f32.mrb[3].mxu1 }
  0xf8   : > { %v2161_v58 = vpop.f32.mrb[4].mxu1 }
  0xf9   : > { %v521_v59 = vpop.f32.mrb[5].mxu1 }
  0xfa   : > { %v2162_v60 = vpop.f32.mrb[6].mxu1 }
  0xfb   : > { %v524_v61 = vpop.f32.mrb[7].mxu1 }
 0x100   : > { %v2716_v62 = vpop.f32.mrb[8].mxu1 }
 0x101   : > { %v2718_v63 = vpop.f32.mrb[9].mxu1 }
 0x102   : > { %v2720_v0 = vpop.f32.mrb[10].mxu1 }
 0x103   : > { %v2722_v1 = vpop.f32.mrb[11].mxu1 }
 0x108   : > { %v2724_v2 = vpop.f32.mrb[12].mxu1 }
 0x109   : > { %v2726_v3 = vpop.f32.mrb[13].mxu1 }
 0x10a   : > { %v2728_v4 = vpop.f32.mrb[14].mxu1 }
 0x10b   : > { %v2730_v5 = vpop.f32.mrb[15].mxu1 }
 0x110   : > { %v2225_v6 = vpop.f32.mrb[0].mxu0 }
 0x111   : > { %v2257_v8 = vadd.f32 %v2225_v6, %v2157_v54  ;;  %v1138_v9 = vpop.f32.mrb[1].mxu0 }
 0x112   : > { %v2258_v11 = vadd.f32 %v1138_v9, %v505_v55  ;;  %v2226_v12 = vpop.f32.mrb[2].mxu0 }
 0x113   : > { %v1306_v13 = vmul.f32 %v2257_v8, %v2735_v7  ;;  %v2259_v14 = vadd.f32 %v2226_v12, %v2158_v56  ;;  %v1141_v15 = vpop.f32.mrb[3].mxu0 }
 0x114   : > { %v1304_v16 = vmul.f32 %v2258_v11, %v2735_v7  ;;  %v2260_v17 = vadd.f32 %v1141_v15, %v508_v57 }
 0x115   : > { %v1345_v18 = vadd.f32 %v2740_v10, %v1306_v13  ;;  %v1307_v19 = vmul.f32 %v2259_v14, %v2735_v7 }
 0x116   : > { %v1343_v20 = vadd.f32 %v2740_v10, %v1304_v16  ;;  %v1305_v21 = vmul.f32 %v2260_v17, %v2735_v7 }
 0x117   : > { %vm1377_vm2 = vcmp.gt.f32.partialorder %v1345_v18, 0.0  ;;  %v1409_v22 = vmul.f32 0.1, %v1345_v18  ;;  %v1346_v23 = vadd.f32 %v2740_v10, %v1307_v19 }
 0x118   : > { %vm1375_vm3 = vcmp.gt.f32.partialorder %v1343_v20, 0.0  ;;  %v1407_v24 = vmul.f32 0.1, %v1343_v20  ;;  %v1344_v25 = vadd.f32 %v2740_v10, %v1305_v21  ;;  %v2229_v26 = vpop.f32.mrb[4].mxu0 }
 0x119   : > { %vm1378_vm4 = vcmp.gt.f32.partialorder %v1346_v23, 0.0  ;;  %v1410_v27 = vmul.f32 0.1, %v1346_v23  ;;  %v2261_v28 = vadd.f32 %v2229_v26, %v2161_v58  ;;  %v1154_v29 = vpop.f32.mrb[5].mxu0  ;;  %v1441_v30 = vsel %vm1377_vm2, %v1345_v18, %v1409_v22 }
 0x11a   : > { %vm1376_vm5 = vcmp.gt.f32.partialorder %v1344_v25, 0.0  ;;  %v1408_v31 = vmul.f32 0.1, %v1344_v25  ;;  %v2262_v32 = vadd.f32 %v1154_v29, %v521_v59  ;;  %v2230_v33 = vpop.f32.mrb[6].mxu0  ;;  %v1439_v34 = vsel %vm1375_vm3, %v1343_v20, %v1407_v24 }
 0x11b   : > { %v1442_v35 = vsel %vm1378_vm4, %v1346_v23, %v1410_v27  ;;  %v1310_v36 = vmul.f32 %v2261_v28, %v2735_v7  ;;  %v2263_v37 = vadd.f32 %v2230_v33, %v2162_v60  ;;  %v1157_v38 = vpop.f32.mrb[7].mxu0 }
 0x11c   : > { %v2015_v39 = vpack.c.bf16 %v1442_v35, %v1441_v30  ;;  %v1440_v40 = vsel %vm1376_vm5, %v1344_v25, %v1408_v31  ;;  %v1308_v41 = vmul.f32 %v2262_v32, %v2735_v7  ;;  %v2264_v42 = vadd.f32 %v1157_v38, %v524_v61 }
 0x11d   : > { %v2010_v43 = vpack.c.bf16 %v1440_v40, %v1439_v34  ;;  %v1349_v44 = vadd.f32 %v2740_v10, %v1310_v36  ;;  %v1311_v45 = vmul.f32 %v2263_v37, %v2735_v7 }
 0x11e   : > { %2087 = vst [vmem:[%s2757_s30 + $0x8] sm:$0xff] %v2015_v39   ;;  %v1347_v46 = vadd.f32 %v2740_v10, %v1308_v41  ;;  %v1309_v47 = vmul.f32 %v2264_v42, %v2735_v7 }
 0x11f   : > { %2011 = vst [vmem:[%s2757_s30] sm:$0xff] %v2010_v43   ;;  %vm1381_vm6 = vcmp.gt.f32.partialorder %v1349_v44, 0.0  ;;  %v1413_v48 = vmul.f32 0.1, %v1349_v44  ;;  %v1350_v49 = vadd.f32 %v2740_v10, %v1311_v45 }
 0x120   : > { %vm1379_vm7 = vcmp.gt.f32.partialorder %v1347_v46, 0.0  ;;  %v1411_v50 = vmul.f32 0.1, %v1347_v46  ;;  %v1348_v51 = vadd.f32 %v2740_v10, %v1309_v47  ;;  %v2233_v52 = vpop.f32.mrb[8].mxu0 }
 0x121   : > { %vm1382_vm8 = vcmp.gt.f32.partialorder %v1350_v49, 0.0  ;;  %v1414_v53 = vmul.f32 0.1, %v1350_v49  ;;  %v2265_v54 = vadd.f32 %v2233_v52, %v2716_v62  ;;  %v1170_v55 = vpop.f32.mrb[9].mxu0  ;;  %v1445_v56 = vsel %vm1381_vm6, %v1349_v44, %v1413_v48 }
 0x122   : > { %vm1380_vm9 = vcmp.gt.f32.partialorder %v1348_v51, 0.0  ;;  %v1412_v57 = vmul.f32 0.1, %v1348_v51  ;;  %v2266_v58 = vadd.f32 %v1170_v55, %v2718_v63  ;;  %v2234_v59 = vpop.f32.mrb[10].mxu0  ;;  %v1443_v60 = vsel %vm1379_vm7, %v1347_v46, %v1411_v50 }
 0x123   : > { %v1446_v61 = vsel %vm1382_vm8, %v1350_v49, %v1414_v53  ;;  %v1314_v6 = vmul.f32 %v2265_v54, %v2735_v7  ;;  %v2267_v8 = vadd.f32 %v2234_v59, %v2720_v0  ;;  %v1173_v9 = vpop.f32.mrb[11].mxu0 }
 0x124   : > { %v2025_v11 = vpack.c.bf16 %v1446_v61, %v1445_v56  ;;  %v1444_v12 = vsel %vm1380_vm9, %v1348_v51, %v1412_v57  ;;  %v1312_v62 = vmul.f32 %v2266_v58, %v2735_v7  ;;  %v2268_v13 = vadd.f32 %v1173_v9, %v2722_v1 }
 0x125   : > { %v2020_v14 = vpack.c.bf16 %v1444_v12, %v1443_v60  ;;  %v1353_v15 = vadd.f32 %v2740_v10, %v1314_v6  ;;  %v1315_v63 = vmul.f32 %v2267_v8, %v2735_v7 }
 0x126   : > { %2089 = vst [vmem:[%s2757_s30 + $0x18] sm:$0xff] %v2025_v11   ;;  %v1351_v16 = vadd.f32 %v2740_v10, %v1312_v62  ;;  %v1313_v17 = vmul.f32 %v2268_v13, %v2735_v7 }
 0x127   : > { %2088 = vst [vmem:[%s2757_s30 + $0x10] sm:$0xff] %v2020_v14   ;;  %vm1385_vm10 = vcmp.gt.f32.partialorder %v1353_v15, 0.0  ;;  %v1417_v0 = vmul.f32 0.1, %v1353_v15  ;;  %v1354_v18 = vadd.f32 %v2740_v10, %v1315_v63 }
 0x128   : > { %vm1383_vm11 = vcmp.gt.f32.partialorder %v1351_v16, 0.0  ;;  %v1415_v19 = vmul.f32 0.1, %v1351_v16  ;;  %v1352_v20 = vadd.f32 %v2740_v10, %v1313_v17  ;;  %v2237_v1 = vpop.f32.mrb[12].mxu0 }
 0x129   : > { %vm1386_vm12 = vcmp.gt.f32.partialorder %v1354_v18, 0.0  ;;  %v1418_v21 = vmul.f32 0.1, %v1354_v18  ;;  %v2269_v22 = vadd.f32 %v2237_v1, %v2724_v2  ;;  %v1186_v23 = vpop.f32.mrb[13].mxu0  ;;  %v1449_v24 = vsel %vm1385_vm10, %v1353_v15, %v1417_v0 }
 0x12a   : > { %vm1384_vm13 = vcmp.gt.f32.partialorder %v1352_v20, 0.0  ;;  %v1416_v25 = vmul.f32 0.1, %v1352_v20  ;;  %v2270_v26 = vadd.f32 %v1186_v23, %v2726_v3  ;;  %v2238_v27 = vpop.f32.mrb[14].mxu0  ;;  %v1447_v28 = vsel %vm1383_vm11, %v1351_v16, %v1415_v19 }
 0x12b   : > { %v1450_v29 = vsel %vm1386_vm12, %v1354_v18, %v1418_v21  ;;  %v1318_v30 = vmul.f32 %v2269_v22, %v2735_v7  ;;  %v2271_v31 = vadd.f32 %v2238_v27, %v2728_v4  ;;  %v1189_v32 = vpop.f32.mrb[15].mxu0 }
 0x12c   : > { %v2035_v33 = vpack.c.bf16 %v1450_v29, %v1449_v24  ;;  %v1448_v34 = vsel %vm1384_vm13, %v1352_v20, %v1416_v25  ;;  %v1316_v2 = vmul.f32 %v2270_v26, %v2735_v7  ;;  %v2272_v35 = vadd.f32 %v1189_v32, %v2730_v5 }
 0x12d   : > { %v2030_v36 = vpack.c.bf16 %v1448_v34, %v1447_v28  ;;  %v1357_v37 = vadd.f32 %v2740_v10, %v1318_v30  ;;  %v1319_v3 = vmul.f32 %v2271_v31, %v2735_v7 }
 0x12e   : > { %2091 = vst [vmem:[%s2757_s30 + $0x28] sm:$0xff] %v2035_v33   ;;  %v1355_v38 = vadd.f32 %v2740_v10, %v1316_v2  ;;  %v1317_v39 = vmul.f32 %v2272_v35, %v2735_v7 }
 0x12f   : > { %2090 = vst [vmem:[%s2757_s30 + $0x20] sm:$0xff] %v2030_v36   ;;  %vm1389_vm14 = vcmp.gt.f32.partialorder %v1357_v37, 0.0  ;;  %v1421_v4 = vmul.f32 0.1, %v1357_v37  ;;  %v1358_v40 = vadd.f32 %v2740_v10, %v1319_v3 }
 0x130   : > { %v2207_v41 = vpop.f32.mrb[16].mxu1  ;;  %vm1387_vm15 = vcmp.gt.f32.partialorder %v1355_v38, 0.0  ;;  %v1419_v42 = vmul.f32 0.1, %v1355_v38  ;;  %v1356_v5 = vadd.f32 %v2740_v10, %v1317_v39  ;;  %v2241_v43 = vpop.f32.mrb[16].mxu0 }
 0x131   : > { %v866_v44 = vpop.f32.mrb[17].mxu1  ;;  %vm1390_vm0 = vcmp.gt.f32.partialorder %v1358_v40, 0.0  ;;  %v1422_v45 = vmul.f32 0.1, %v1358_v40  ;;  %v2273_v46 = vadd.f32 %v2241_v43, %v2207_v41  ;;  %v1202_v47 = vpop.f32.mrb[17].mxu0  ;;  %v1453_v49 = vsel %vm1389_vm14, %v1357_v37, %v1421_v4 }
 0x132   : > { %v2208_v48 = vpop.f32.mrb[18].mxu1  ;;  %vm1388_vm1 = vcmp.gt.f32.partialorder %v1356_v5, 0.0  ;;  %v1420_v50 = vmul.f32 0.1, %v1356_v5  ;;  %v2274_v51 = vadd.f32 %v1202_v47, %v866_v44  ;;  %v2242_v52 = vpop.f32.mrb[18].mxu0  ;;  %v1451_v54 = vsel %vm1387_vm15, %v1355_v38, %v1419_v42 }
 0x133   : > { %v869_v53 = vpop.f32.mrb[19].mxu1  ;;  %v1454_v55 = vsel %vm1390_vm0, %v1358_v40, %v1422_v45  ;;  %v1322_v56 = vmul.f32 %v2273_v46, %v2735_v7  ;;  %v2275_v57 = vadd.f32 %v2242_v52, %v2208_v48  ;;  %v1205_v58 = vpop.f32.mrb[19].mxu0 }
 0x134   : > { %v2045_v59 = vpack.c.bf16 %v1454_v55, %v1453_v49  ;;  %v1452_v60 = vsel %vm1388_vm1, %v1356_v5, %v1420_v50  ;;  %v1320_v61 = vmul.f32 %v2274_v51, %v2735_v7  ;;  %v2276_v6 = vadd.f32 %v1205_v58, %v869_v53 }
 0x135   : > { %v2040_v8 = vpack.c.bf16 %v1452_v60, %v1451_v54  ;;  %v1361_v9 = vadd.f32 %v2740_v10, %v1322_v56  ;;  %v1323_v11 = vmul.f32 %v2275_v57, %v2735_v7 }
 0x136   : > { %2093 = vst [vmem:[%s2757_s30 + $0x38] sm:$0xff] %v2045_v59   ;;  %v1359_v12 = vadd.f32 %v2740_v10, %v1320_v61  ;;  %v1321_v62 = vmul.f32 %v2276_v6, %v2735_v7 }
 0x137   : > { %2092 = vst [vmem:[%s2757_s30 + $0x30] sm:$0xff] %v2040_v8   ;;  %vm1393_vm2 = vcmp.gt.f32.partialorder %v1361_v9, 0.0  ;;  %v1425_v13 = vmul.f32 0.1, %v1361_v9  ;;  %v1362_v14 = vadd.f32 %v2740_v10, %v1323_v11 }
 0x138   : > { %v2211_v15 = vpop.f32.mrb[20].mxu1  ;;  %vm1391_vm3 = vcmp.gt.f32.partialorder %v1359_v12, 0.0  ;;  %v1423_v63 = vmul.f32 0.1, %v1359_v12  ;;  %v1360_v16 = vadd.f32 %v2740_v10, %v1321_v62  ;;  %v2245_v17 = vpop.f32.mrb[20].mxu0 }
 0x139   : > { %v882_v0 = vpop.f32.mrb[21].mxu1  ;;  %vm1394_vm4 = vcmp.gt.f32.partialorder %v1362_v14, 0.0  ;;  %v1426_v18 = vmul.f32 0.1, %v1362_v14  ;;  %v2277_v19 = vadd.f32 %v2245_v17, %v2211_v15  ;;  %v1218_v20 = vpop.f32.mrb[21].mxu0  ;;  %v1457_v21 = vsel %vm1393_vm2, %v1361_v9, %v1425_v13 }
 0x13a   : > { %v2212_v1 = vpop.f32.mrb[22].mxu1  ;;  %vm1392_vm5 = vcmp.gt.f32.partialorder %v1360_v16, 0.0  ;;  %v1424_v22 = vmul.f32 0.1, %v1360_v16  ;;  %v2278_v23 = vadd.f32 %v1218_v20, %v882_v0  ;;  %v2246_v24 = vpop.f32.mrb[22].mxu0  ;;  %v1455_v26 = vsel %vm1391_vm3, %v1359_v12, %v1423_v63 }
 0x13b   : > { %v885_v25 = vpop.f32.mrb[23].mxu1  ;;  %v1458_v27 = vsel %vm1394_vm4, %v1362_v14, %v1426_v18  ;;  %v1326_v28 = vmul.f32 %v2277_v19, %v2735_v7  ;;  %v2279_v29 = vadd.f32 %v2246_v24, %v2212_v1  ;;  %v1221_v30 = vpop.f32.mrb[23].mxu0 }
 0x13c   : > { %v2055_v31 = vpack.c.bf16 %v1458_v27, %v1457_v21  ;;  %v1456_v32 = vsel %vm1392_vm5, %v1360_v16, %v1424_v22  ;;  %v1324_v33 = vmul.f32 %v2278_v23, %v2735_v7  ;;  %v2280_v34 = vadd.f32 %v1221_v30, %v885_v25 }
 0x13d   : > { %v2050_v2 = vpack.c.bf16 %v1456_v32, %v1455_v26  ;;  %v1365_v35 = vadd.f32 %v2740_v10, %v1326_v28  ;;  %v1327_v36 = vmul.f32 %v2279_v29, %v2735_v7 }
 0x13e   : > { %2095 = vst [vmem:[%s2757_s30 + $0x48] sm:$0xff] %v2055_v31   ;;  %v1363_v37 = vadd.f32 %v2740_v10, %v1324_v33  ;;  %v1325_v3 = vmul.f32 %v2280_v34, %v2735_v7 }
 0x13f   : > { %2094 = vst [vmem:[%s2757_s30 + $0x40] sm:$0xff] %v2050_v2   ;;  %vm1397_vm6 = vcmp.gt.f32.partialorder %v1365_v35, 0.0  ;;  %v1429_v38 = vmul.f32 0.1, %v1365_v35  ;;  %v1366_v39 = vadd.f32 %v2740_v10, %v1327_v36 }
 0x140   : > { %v2215_v4 = vpop.f32.mrb[24].mxu1  ;;  %vm1395_vm7 = vcmp.gt.f32.partialorder %v1363_v37, 0.0  ;;  %v1427_v40 = vmul.f32 0.1, %v1363_v37  ;;  %v1364_v41 = vadd.f32 %v2740_v10, %v1325_v3  ;;  %v2249_v42 = vpop.f32.mrb[24].mxu0 }
 0x141   : > { %v898_v5 = vpop.f32.mrb[25].mxu1  ;;  %vm1398_vm8 = vcmp.gt.f32.partialorder %v1366_v39, 0.0  ;;  %v1430_v43 = vmul.f32 0.1, %v1366_v39  ;;  %v2281_v44 = vadd.f32 %v2249_v42, %v2215_v4  ;;  %v1234_v45 = vpop.f32.mrb[25].mxu0  ;;  %v1461_v47 = vsel %vm1397_vm6, %v1365_v35, %v1429_v38 }
 0x142   : > { %v2216_v46 = vpop.f32.mrb[26].mxu1  ;;  %vm1396_vm9 = vcmp.gt.f32.partialorder %v1364_v41, 0.0  ;;  %v1428_v48 = vmul.f32 0.1, %v1364_v41  ;;  %v2282_v49 = vadd.f32 %v1234_v45, %v898_v5  ;;  %v2250_v50 = vpop.f32.mrb[26].mxu0  ;;  %v1459_v52 = vsel %vm1395_vm7, %v1363_v37, %v1427_v40 }
 0x143   : > { %v901_v51 = vpop.f32.mrb[27].mxu1  ;;  %v1462_v53 = vsel %vm1398_vm8, %v1366_v39, %v1430_v43  ;;  %v1330_v54 = vmul.f32 %v2281_v44, %v2735_v7  ;;  %v2283_v55 = vadd.f32 %v2250_v50, %v2216_v46  ;;  %v1237_v56 = vpop.f32.mrb[27].mxu0 }
 0x144   : > { %v2065_v57 = vpack.c.bf16 %v1462_v53, %v1461_v47  ;;  %v1460_v58 = vsel %vm1396_vm9, %v1364_v41, %v1428_v48  ;;  %v1328_v59 = vmul.f32 %v2282_v49, %v2735_v7  ;;  %v2284_v60 = vadd.f32 %v1237_v56, %v901_v51 }
 0x145   : > { %v2060_v61 = vpack.c.bf16 %v1460_v58, %v1459_v52  ;;  %v1369_v6 = vadd.f32 %v2740_v10, %v1330_v54  ;;  %v1331_v8 = vmul.f32 %v2283_v55, %v2735_v7 }
 0x146   : > { %2097 = vst [vmem:[%s2757_s30 + $0x58] sm:$0xff] %v2065_v57   ;;  %v1367_v9 = vadd.f32 %v2740_v10, %v1328_v59  ;;  %v1329_v11 = vmul.f32 %v2284_v60, %v2735_v7 }
 0x147   : > { %2096 = vst [vmem:[%s2757_s30 + $0x50] sm:$0xff] %v2060_v61   ;;  %vm1401_vm10 = vcmp.gt.f32.partialorder %v1369_v6, 0.0  ;;  %v1433_v12 = vmul.f32 0.1, %v1369_v6  ;;  %v1370_v62 = vadd.f32 %v2740_v10, %v1331_v8 }
 0x148   : > { %v2219_v13 = vpop.f32.mrb[28].mxu1  ;;  %vm1399_vm11 = vcmp.gt.f32.partialorder %v1367_v9, 0.0  ;;  %v1431_v14 = vmul.f32 0.1, %v1367_v9  ;;  %v1368_v15 = vadd.f32 %v2740_v10, %v1329_v11  ;;  %v2253_v63 = vpop.f32.mrb[28].mxu0 }
 0x149   : > { %v914_v16 = vpop.f32.mrb[29].mxu1  ;;  %vm1402_vm12 = vcmp.gt.f32.partialorder %v1370_v62, 0.0  ;;  %v1434_v17 = vmul.f32 0.1, %v1370_v62  ;;  %v2285_v0 = vadd.f32 %v2253_v63, %v2219_v13  ;;  %v1250_v18 = vpop.f32.mrb[29].mxu0  ;;  %v1465_v20 = vsel %vm1401_vm10, %v1369_v6, %v1433_v12 }
 0x14a   : > { %v2220_v19 = vpop.f32.mrb[30].mxu1  ;;  %vm1400_vm13 = vcmp.gt.f32.partialorder %v1368_v15, 0.0  ;;  %v1432_v1 = vmul.f32 0.1, %v1368_v15  ;;  %v2286_v21 = vadd.f32 %v1250_v18, %v914_v16  ;;  %v2254_v22 = vpop.f32.mrb[30].mxu0  ;;  %v1463_v24 = vsel %vm1399_vm11, %v1367_v9, %v1431_v14 }
 0x14b   : > { %v917_v23 = vpop.f32.mrb[31].mxu1  ;;  %v1466_v25 = vsel %vm1402_vm12, %v1370_v62, %v1434_v17  ;;  %v1334_v26 = vmul.f32 %v2285_v0, %v2735_v7  ;;  %v2287_v27 = vadd.f32 %v2254_v22, %v2220_v19  ;;  %v1253_v28 = vpop.f32.mrb[31].mxu0 }
 0x14c   : > { %v2075_v29 = vpack.c.bf16 %v1466_v25, %v1465_v20  ;;  %v1464_v30 = vsel %vm1400_vm13, %v1368_v15, %v1432_v1  ;;  %v1332_v31 = vmul.f32 %v2286_v21, %v2735_v7  ;;  %v2288_v32 = vadd.f32 %v1253_v28, %v917_v23 }
 0x14d   : > { %v2070_v33 = vpack.c.bf16 %v1464_v30, %v1463_v24  ;;  %v1373_v34 = vadd.f32 %v2740_v10, %v1334_v26  ;;  %v1335_v2 = vmul.f32 %v2287_v27, %v2735_v7 }
 0x14e   : > { %2099 = vst [vmem:[%s2757_s30 + $0x68] sm:$0xff] %v2075_v29   ;;  %v1371_v35 = vadd.f32 %v2740_v10, %v1332_v31  ;;  %v1333_v36 = vmul.f32 %v2288_v32, %v2735_v7 }
 0x14f   : > { %2098 = vst [vmem:[%s2757_s30 + $0x60] sm:$0xff] %v2070_v33   ;;  %v1437_v37 = vmul.f32 0.1, %v1373_v34  ;;  %v1374_v3 = vadd.f32 %v2740_v10, %v1335_v2  ;;  %vm1405_vm14 = vcmp.gt.f32.partialorder %v1373_v34, 0.0 }
 0x150   : > { %v1435_v38 = vmul.f32 0.1, %v1371_v35  ;;  %v1372_v39 = vadd.f32 %v2740_v10, %v1333_v36  ;;  %vm1403_vm15 = vcmp.gt.f32.partialorder %v1371_v35, 0.0 }
 0x151   : > { %vm1406_vm0 = vcmp.gt.f32.partialorder %v1374_v3, 0.0  ;;  %v1438_v4 = vmul.f32 0.1, %v1374_v3  ;;  %v1469_v7 = vsel %vm1405_vm14, %v1373_v34, %v1437_v37 }
 0x152   : > { %vm1404_vm1 = vcmp.gt.f32.partialorder %v1372_v39, 0.0  ;;  %v1436_v40 = vmul.f32 0.1, %v1372_v39  ;;  %v1467_v42 = vsel %vm1403_vm15, %v1371_v35, %v1435_v38 }
 0x153   : > { %v1470_v41 = vsel %vm1406_vm0, %v1374_v3, %v1438_v4 }
 0x154   : > { %v2085_v5 = vpack.c.bf16 %v1470_v41, %v1469_v7  ;;  %v1468_v43 = vsel %vm1404_vm1, %v1372_v39, %v1436_v40 }
 0x155   : > { %v2080_v10 = vpack.c.bf16 %v1468_v43, %v1467_v42 }
 0x156   : > { %2101 = vst [vmem:[%s2757_s30 + $0x78] sm:$0xff] %v2085_v5  }
 0x157   : > { %2100 = vst [vmem:[%s2757_s30 + $0x70] sm:$0xff] %v2080_v10  }
 0x158   : > { %2447 = shalt.err (!%p2444_p5)
}
 0x159   : > { %s2448_s14 = scalar_lea.hbm %s2842_s9, 2048  ;;  %s2452_s24 = scalar_lea.hbm %s2900_s4, 4096 }
 0x15a   : > { %p2449_p6 = scmp.ne.s32.totalorder %s2842_s9, %s2448_s14  ;;  %p2453_p10 = scmp.lt.u32.totalorder %s2842_s9, %s2900_s4 }
 0x15b   : > { %p2454_p11 = scmp.lt.u32.totalorder %s2452_s24, %s2448_s14  ;;  %p2456_p13 = scmp.lt.u32.totalorder %s2448_s14, %s2842_s9 }
 0x15c   : > { %p2450_p7 = pnand %p2449_p6, %p2582_p4 }
 0x15d   : > { %p2455_p12 = por %p2454_p11, %p2453_p10 }
 0x15e   : > { %p2451_p9 = pneg %p2450_p7 }
 0x15f   : > { %p2457_p0 = por %p2456_p13, %p2455_p12 }
 0x161   : > { %p2458_p1 = pnand %p2457_p0, %p2451_p9 }
 0x163   : > { %2461 = shalt.err (!%p2458_p1)
}
 0x164   : > { %s2515_s30 = smov 64   ;;  %s2516_s5 = smov 4  }
 0x165   : > { %2326 = dma.vmem_to_hbm [thread:$0]  (%p2582_p4), %s2844_s6, 2048, %s2842_s9, %s2850_s18, %s2515_s30, %s2515_s30, %s2516_s5  }
 0x166 PF: > { %p2332_p2 = scmp.ge.s32.totalorder %s2512_s20, 2  ;;  %s1663_s7 = sand.u32 1, %s2492_s15  }
 0x167   : > { %s1664_s8 = scalar_lea.sflag [#allocation3], %s1663_s7 }
 0x168   : > { %p2329_p3 = pnand %p2332_p2, %p2589_p8 }
 0x16a   : > { %2487 = dma.done.wait (!%p2329_p3), %s1664_s8, 2048  }
 0x16b   : > { %2489 = vsyncadd (!%p2329_p3), %s1664_s8, 4294965248  ;;  %s17_s20 = sadd.s32 1, %s2512_s20   ;;  %s2903_s15 = smov %s2496_s16 }
 0x16c   : > { %p14_p5 = scmp.ge.s32.totalorder %s17_s20, 4   ;;  %s2904_s16 = smov %s2500_s17 }
 0x16d   : > { %s2905_s17 = smov %s2595_s28  ;;  %s2906_s18 = smov %s2508_s19 }
 0x16e   : > { %s2907_s19 = smov %s2909_s23  ;;  %16 = sbr.rel (!%p14_p5) target bundleno = 4 (0x4), region = 82 }
 0x175   :  { %1669 = vsyncpa [#allocation3], 1 }
 0x176   :  { %1671 = vsyncpa [#allocation3 + $0x1], 1 }

</bundles_post_ra>
